<compile_context>
chip_gen: v7x
topology: tpu7x:2x2x1
jax: 0.10.0
libtpu: 0.0.40
codegen_flags: <defaults>
</compile_context>

<pallas_src>
from functools import partial

import jax
import jax.numpy as jnp
from jax.experimental import pallas as pl
from jax.experimental.pallas import tpu as pltpu

# Small demo shapes consistent with the module (3 channels implied by mean/std).
B, C, H, W = 2, 3, 16, 16
NUM_CLASSES = 10
LANE = 128
SUBLANE = 8

CIFAR_MEAN = (0.4914, 0.4822, 0.4465)
CIFAR_STD = (0.2471, 0.2435, 0.2616)


def _linear_kernel(x_ref, w_ref, b_ref, out_ref):
    """One lane-dense MXU matmul + bias add.

    x_ref   : [tile_b, K]      bf16 VMEM (normalization folded into w/b)
    w_ref   : [K, N_pad]       bf16 VMEM (grid-invariant)
    b_ref   : [1, N_pad]       f32  VMEM (grid-invariant)
    out_ref : [tile_b, N_pad]  f32  VMEM (unmasked, lane-dense stores)
    """
    out_ref[...] = (
        jnp.dot(x_ref[...], w_ref[...], preferred_element_type=jnp.float32)
        + b_ref[...]
    )


def _pick_batch_tile(batch):
    """Largest power-of-two tile <= min(2048, batch // 2), floor 8 sublanes.

    - cap 2048 keeps the bf16 double-buffered footprint (~8 MiB) inside every
      generation's scoped-VMEM default;
    - batch // 2 guarantees >= 2 grid steps when the batch allows, so the
      "parallel" axis actually shards across both v7x TensorCores;
    - tiny batches round up to one full 8-sublane tile (padded in the wrapper).
    """
    if batch <= SUBLANE:
        return SUBLANE
    limit = min(2048, max(SUBLANE, batch // 2))
    tile = SUBLANE
    while tile * 2 <= limit:
        tile *= 2
    return tile


def fold_normalize_into_linear(w, b, mean, std):
    """One-time host-side fold of transforms.Normalize into the linear layer.

    Returns (w_p [K, N_pad] bf16, b_p [1, N_pad] f32).  Exact for a linear
    inner model; if the wrapped model were nonlinear, normalization would have
    to return to the kernel instead.
    """
    c, hw, n = w.shape
    k = c * hw
    inv_std = 1.0 / std
    w_scaled = (w * inv_std[:, None, None]).reshape(k, n)                  # [K, N]
    b_eff = b - jnp.einsum("c,cn->n", mean * inv_std, w.sum(axis=1))[None, :]

    n_pad = ((n + LANE - 1) // LANE) * LANE
    w_p = jnp.pad(w_scaled, ((0, 0), (0, n_pad - n))).astype(jnp.bfloat16)
    b_p = jnp.pad(b_eff, ((0, 0), (0, n_pad - n))).astype(jnp.float32)
    return w_p, b_p


@partial(jax.jit, static_argnames=("num_classes",))
def cifar10_model_forward(x, w_p, b_p, num_classes):
    """x: [B,C,H,W] f32; w_p: [K,N_pad] bf16; b_p: [1,N_pad] f32 (pre-folded)."""
    batch = x.shape[0]
    k = x.shape[1] * x.shape[2] * x.shape[3]
    n_pad = w_p.shape[-1]

    # Lane-dense bf16 activation slab [B, C*H*W] (K = 768 = 6 * 128 for demo).
    x_flat = x.reshape(batch, k).astype(jnp.bfloat16)

    # Pad batch to a whole number of tiles -> uniform grid, bounded footprint.
    tile_b = _pick_batch_tile(batch)
    batch_pad = ((batch + tile_b - 1) // tile_b) * tile_b
    if batch_pad != batch:
        x_flat = jnp.pad(x_flat, ((0, batch_pad - batch), (0, 0)))

    grid = (batch_pad // tile_b,)

    out_p = pl.pallas_call(
        _linear_kernel,
        out_shape=jax.ShapeDtypeStruct((batch_pad, n_pad), jnp.float32),
        grid=grid,
        in_specs=[
            pl.BlockSpec((tile_b, k), lambda i: (i, 0)),   # x tile (bf16)
            pl.BlockSpec((k, n_pad), lambda i: (0, 0)),    # folded weights (bf16)
            pl.BlockSpec((1, n_pad), lambda i: (0, 0)),    # folded bias (f32)
        ],
        out_specs=pl.BlockSpec((tile_b, n_pad), lambda i: (i, 0)),
        compiler_params=pltpu.CompilerParams(
            dimension_semantics=("parallel",),
            vmem_limit_bytes=48 * 1024 * 1024,  # headroom for large tiles, safe on v5e/v6e/v7x
        ),
    )(x_flat, w_p, b_p)

    return out_p[:batch, :num_classes]


def _reference(x, w, b, mean, std):
    xn = (x - mean[None, :, None, None]) / std[None, :, None, None]
    w_flat = w.reshape(C * H * W, NUM_CLASSES)
    return xn.reshape(B, C * H * W) @ w_flat + b


if __name__ == "__main__":
    key = jax.random.PRNGKey(0)
    kx, kw = jax.random.split(key)

    # Deterministic synthetic parameters / inputs.
    x = jax.random.uniform(kx, (B, C, H, W), dtype=jnp.float32)  # image in [0,1]
    # TODO(synk): wrapped `model` is unspecified in the PyTorch module; using a
    # deterministic single linear classifier as the inner model.
    w = 0.02 * jax.random.normal(kw, (C, H * W, NUM_CLASSES), dtype=jnp.float32)
    b = jnp.zeros((1, NUM_CLASSES), dtype=jnp.float32)
    mean = jnp.asarray(CIFAR_MEAN, dtype=jnp.float32)
    std = jnp.asarray(CIFAR_STD, dtype=jnp.float32)

    # One-time (hoisted) normalize fold + padding + bf16 cast.
    w_p, b_p = fold_normalize_into_linear(w, b, mean, std)
    w_p, b_p = jax.block_until_ready((w_p, b_p))

    out = cifar10_model_forward(x, w_p, b_p, NUM_CLASSES)
    out = jax.block_until_ready(out)

    ref = _reference(x, w, b, mean, std)
    assert out.shape == (B, NUM_CLASSES)
    # bf16 activations/weights (f32 accumulation) -> relaxed tolerance vs f32 ref.
    assert jnp.allclose(out, ref, atol=2e-2, rtol=2e-2), "mismatch vs reference"

    print("KERNEL_OK")
</pallas_src>

<mosaic_0001>
module attributes {stable_mosaic.version = 11 : i64} {
  func.func @_linear_kernel(%arg0: i32, %arg1: memref<8x768xbf16, #tpu.memory_space<vmem>>, %arg2: memref<768x128xbf16, #tpu.memory_space<vmem>>, %arg3: memref<1x128xf32, #tpu.memory_space<vmem>>, %arg4: memref<8x128xf32, #tpu.memory_space<vmem>>) attributes {dimension_semantics = [#tpu.dimension_semantics<parallel>], iteration_bounds = array<i64: 1>, scalar_prefetch = 0 : i64, scratch_operands = 0 : i64, tpu.core_type = #tpu.core_type<tc>, window_params = [{transform_indices = @transform_0, window_bounds = array<i64: 8, 768>}, {pipeline_mode = #tpu.pipeline_mode<synchronous>, transform_indices = @transform_1, window_bounds = array<i64: 768, 128>}, {pipeline_mode = #tpu.pipeline_mode<synchronous>, transform_indices = @transform_2, window_bounds = array<i64: 1, 128>}, {transform_indices = @transform_3, window_bounds = array<i64: 8, 128>}]} {
    %c0 = arith.constant 0 : index
    %c0_0 = arith.constant 0 : index
    %0 = vector.load %arg1[%c0, %c0_0] : memref<8x768xbf16, #tpu.memory_space<vmem>>, vector<8x768xbf16>
    %c0_1 = arith.constant 0 : index
    %c0_2 = arith.constant 0 : index
    %1 = vector.load %arg2[%c0_1, %c0_2] : memref<768x128xbf16, #tpu.memory_space<vmem>>, vector<768x128xbf16>
    %cst = arith.constant dense<0.000000e+00> : vector<8x128xf32>
    %2 = tpu.matmul %0, %1, %cst {dimension_numbers = #tpu.dot_dimension_numbers<[1], [0], [0], [1], [0, 0, 1, 1], [], []>} : vector<8x768xbf16>, vector<768x128xbf16>, vector<8x128xf32> -> vector<8x128xf32>
    %c0_3 = arith.constant 0 : index
    %c0_4 = arith.constant 0 : index
    %3 = vector.load %arg3[%c0_3, %c0_4] : memref<1x128xf32, #tpu.memory_space<vmem>>, vector<1x128xf32>
    %4 = vector.broadcast %3 : vector<1x128xf32> to vector<8x128xf32>
    %5 = arith.addf %2, %4 : vector<8x128xf32>
    %c0_5 = arith.constant 0 : index
    %c0_6 = arith.constant 0 : index
    %6 = vector.load %arg4[%c0_5, %c0_6] : memref<8x128xf32, #tpu.memory_space<vmem>>, vector<8x128xf32>
    tpu.vector_store %arg4[%c0_5, %c0_6], %5 {strides = array<i32>} : memref<8x128xf32, #tpu.memory_space<vmem>>, vector<8x128xf32>,
    return
  }
  func.func @transform_0(%arg0: i32) -> (i32, i32) {
    %c0_i32 = arith.constant 0 : i32
    %c0_i32_0 = arith.constant 0 : i32
    return %arg0, %c0_i32 : i32, i32
  }
  func.func @transform_1(%arg0: i32) -> (i32, i32) {
    %c0_i32 = arith.constant 0 : i32
    %c0_i32_0 = arith.constant 0 : i32
    %c0_i32_1 = arith.constant 0 : i32
    return %c0_i32, %c0_i32_0 : i32, i32
  }
  func.func @transform_2(%arg0: i32) -> (i32, i32) {
    %c0_i32 = arith.constant 0 : i32
    %c0_i32_0 = arith.constant 0 : i32
    %c0_i32_1 = arith.constant 0 : i32
    return %c0_i32, %c0_i32_0 : i32, i32
  }
  func.func @transform_3(%arg0: i32) -> (i32, i32) {
    %c0_i32 = arith.constant 0 : i32
    %c0_i32_0 = arith.constant 0 : i32
    return %arg0, %c0_i32 : i32, i32
  }
}

</mosaic_0001>

<bundles_post_ra>
// kernel: cifar10_model_forward.1
= control target key start
LH: loop header
LB: loop body
LE: loop exit
PB: predicated region body
PF: predicated region fallthrough
CT: control target
= control target key end

     0   :  { %8 = vsyncpa [#allocation3], 0  ;;  %s772_s12 = smov [#allocation2]   ;;  %s822_s0 = inlined_call_operand.vmem [shape: bf16[8,768], index: 0, kind: input, shape index: {}]   ;;  %s823_s1 = inlined_call_operand.hbm [shape: bf16[768,128], index: 1, kind: input, shape index: {}]   ;;  %s824_s2 = inlined_call_operand.vmem [shape: f32[1,128], index: 2, kind: input, shape index: {}]   ;;  %s825_s3 = inlined_call_operand.vmem [shape: f32[8,128], index: 3, kind: output, shape index: {}]  }
   0x1   :  { %s16_s13 = sshll.u32 %s772_s12, 4  ;;  %s748_s16 = scalar_lea.hbm %s823_s1, 6144  ;;  %s17_s13 = int_to_ptr.vmem [resolvable:$true] %s16_s13 }
   0x2   :  { %p749_p0 = scmp.ne.s32.totalorder %s823_s1, %s748_s16  ;;  %p752_p1 = scmp.lt.u32.totalorder %s748_s16, %s823_s1 }
   0x4   :  { %p754_p2 = pnand %p752_p1, %p749_p0 }
   0x6   :  { %757 = shalt.err (!%p754_p2)
}
   0x7   :  { %s758_s21 = scalar_lea.vmem %s17_s13, 6144  ;;  %p763_p4 = scmp.lt.s32.totalorder %s17_s13, %s17_s13 }
   0x8   :  { %p759_p3 = scmp.ne.s32.totalorder %s17_s13, %s758_s21  ;;  %p764_p5 = scmp.lt.s32.totalorder %s758_s21, %s758_s21 }
   0xa   :  { %p765_p6 = por %p764_p5, %p763_p4 }
   0xc   :  { %p766_p7 = pnand %p765_p6, %p759_p3 }
   0xe   :  { %769 = shalt.err (!%p766_p7)
}
   0xf   :  { %s773_s22 = smov 64   ;;  %s774_s23 = smov 4  }
  0x10   :  { %22 = dma.hbm_to_vmem [thread:$0]  %s823_s1, 6144, %s17_s13, [#allocation3], %s773_s22, %s773_s22, %s774_s23  }
  0x11   :  { %770 = dma.done.wait [#allocation3], 6144  }
  0x12   :  { %771 = vsyncadd [#allocation3], 4294961152  ;;  %v694_v0 = vld [vmem:[#allocation2 + $0x40] sm:$0xff]   ;;  %v698_v4 = vld [vmem:[#allocation2 + $0x48] sm:$0xff]  }
  0x13   :  { %v695_v1 = vld [vmem:[#allocation2] sm:$0xff]   ;;  %625 = vmatprep.subr.bf16.mxu0 %v694_v0  ;;  %v699_v5 = vld [vmem:[#allocation2 + $0x8] sm:$0xff]   ;;  %v702_v8 = vld [vmem:[#allocation2 + $0x50] sm:$0xff]  }
  0x14   :  { %v696_v2 = vld [vmem:[#allocation2 + $0xc0] sm:$0xff]   ;;  %626 = vmatpush3.bf16.msra.mxu0 %v695_v1  ;;  %v700_v6 = vld [vmem:[#allocation2 + $0xc8] sm:$0xff]   ;;  %v703_v9 = vld [vmem:[#allocation2 + $0x10] sm:$0xff]  }
  0x15   :  { %v697_v3 = vld [vmem:[#allocation2 + $0x80] sm:$0xff]   ;;  %647 = vmatprep.subr.bf16.mxu1 %v696_v2  ;;  %627 = vmatprep.subr.bf16.mxu0 %v698_v4  ;;  %v701_v7 = vld [vmem:[#allocation2 + $0x88] sm:$0xff]   ;;  %v704_v10 = vld [vmem:[#allocation2 + $0xd0] sm:$0xff]  }
  0x16   :  { %648 = vmatpush3.bf16.msra.mxu1 %v697_v3  ;;  %v705_v11 = vld [vmem:[#allocation2 + $0x90] sm:$0xff]   ;;  %v706_v12 = vld [vmem:[#allocation2 + $0x58] sm:$0xff]   ;;  %v710_v16 = vld [vmem:[#allocation2 + $0x60] sm:$0xff]  }
  0x17   :  { %649 = vmatprep.subr.bf16.mxu1 %v700_v6  ;;  %v707_v13 = vld [vmem:[#allocation2 + $0x18] sm:$0xff]   ;;  %v711_v17 = vld [vmem:[#allocation2 + $0x20] sm:$0xff]   ;;  %v714_v20 = vld [vmem:[#allocation2 + $0x68] sm:$0xff]  }
  0x18   :  { %628 = vmatpush3.bf16.msra.mxu0 %v699_v5  ;;  %v708_v14 = vld [vmem:[#allocation2 + $0xd8] sm:$0xff]   ;;  %v712_v18 = vld [vmem:[#allocation2 + $0xe0] sm:$0xff]   ;;  %v715_v21 = vld [vmem:[#allocation2 + $0x28] sm:$0xff]  }
  0x19   :  { %629 = vmatprep.subr.bf16.mxu0 %v702_v8  ;;  %v709_v15 = vld [vmem:[#allocation2 + $0x98] sm:$0xff]   ;;  %v713_v19 = vld [vmem:[#allocation2 + $0xa0] sm:$0xff]   ;;  %v716_v22 = vld [vmem:[#allocation2 + $0xe8] sm:$0xff]  }
  0x1a   :  { %650 = vmatpush3.bf16.msra.mxu1 %v701_v7  ;;  %v717_v23 = vld [vmem:[#allocation2 + $0xa8] sm:$0xff]   ;;  %v718_v24 = vld [vmem:[#allocation2 + $0x70] sm:$0xff]   ;;  %v722_v28 = vld [vmem:[#allocation2 + $0x78] sm:$0xff]  }
  0x1b   :  { %651 = vmatprep.subr.bf16.mxu1 %v704_v10  ;;  %v719_v25 = vld [vmem:[#allocation2 + $0x30] sm:$0xff]   ;;  %v723_v29 = vld [vmem:[#allocation2 + $0x38] sm:$0xff]   ;;  %v29_v31 = vld [vmem:[%s822_s0] sm:$0xff] }
  0x1c   :  { %630 = vmatpush3.bf16.msra.mxu0 %v703_v9  ;;  %v720_v26 = vld [vmem:[#allocation2 + $0xf0] sm:$0xff]   ;;  %v724_v30 = vld [vmem:[#allocation2 + $0xf8] sm:$0xff]   ;;  %v571_v32 = vcombine.low %v29_v31, %v29_v31  ;;  %v572_v33 = vcombine.high %v29_v31, %v29_v31  ;;  %v728_v35 = vld [vmem:[#allocation2 + $0x140] sm:$0xff]  }
  0x1d   :  { %631 = vmatprep.subr.bf16.mxu0 %v706_v12  ;;  %v721_v27 = vld [vmem:[#allocation2 + $0xb0] sm:$0xff]   ;;  %v727_v34 = vld [vmem:[#allocation2 + $0xb8] sm:$0xff]   ;;  %v30_v36 = vld [vmem:[%s822_s0 + $0x8] sm:$0xff] }
  0x1e   :  { %652 = vmatpush3.bf16.msra.mxu1 %v705_v11  ;;  %476 = vmatprep.mubr.bf16.mxu0 %v572_v33  ;;  %v573_v37 = vcombine.low %v30_v36, %v30_v36  ;;  %v574_v38 = vcombine.high %v30_v36, %v30_v36  ;;  %v731_v39 = vld [vmem:[#allocation2 + $0x100] sm:$0xff]   ;;  %v732_v40 = vld [vmem:[#allocation2 + $0x148] sm:$0xff]   ;;  %v734_v42 = vld [vmem:[#allocation2 + $0x150] sm:$0xff]  }
  0x1f   :  { %653 = vmatprep.subr.bf16.mxu1 %v708_v14  ;;  %v733_v41 = vld [vmem:[#allocation2 + $0x108] sm:$0xff]   ;;  %v735_v43 = vld [vmem:[#allocation2 + $0x110] sm:$0xff]   ;;  %v736_v44 = vld [vmem:[#allocation2 + $0x158] sm:$0xff]  }
  0x20   :  { %632 = vmatpush3.bf16.msra.mxu0 %v707_v13  ;;  %516 = vmatprep.mubr.bf16.mxu1 %v574_v38  ;;  %v737_v45 = vld [vmem:[#allocation2 + $0x118] sm:$0xff]   ;;  %v738_v46 = vld [vmem:[#allocation2 + $0x160] sm:$0xff]   ;;  %v31_v48 = vld [vmem:[%s822_s0 + $0x10] sm:$0xff] }
  0x21   :  { %633 = vmatprep.subr.bf16.mxu0 %v710_v16  ;;  %v739_v47 = vld [vmem:[#allocation2 + $0x120] sm:$0xff]   ;;  %v740_v49 = vld [vmem:[#allocation2 + $0x168] sm:$0xff]   ;;  %v576_v50 = vcombine.high %v31_v48, %v31_v48  ;;  %v742_v52 = vld [vmem:[#allocation2 + $0x170] sm:$0xff]   ;;  %v575_v56 = vcombine.low %v31_v48, %v31_v48 }
  0x22   :  { %654 = vmatpush3.bf16.msra.mxu1 %v709_v15  ;;  %v741_v51 = vld [vmem:[#allocation2 + $0x128] sm:$0xff]   ;;  %v743_v53 = vld [vmem:[#allocation2 + $0x130] sm:$0xff]   ;;  %v744_v54 = vld [vmem:[#allocation2 + $0x178] sm:$0xff]  }
  0x23   :  { %655 = vmatprep.subr.bf16.mxu1 %v712_v18  ;;  %v745_v55 = vld [vmem:[#allocation2 + $0x138] sm:$0xff]   ;;  %v570_v58 = vld [vmem:[%s824_s2] ss:$0 sm:$0xff] }
  0x24   :  { %634 = vmatpush3.bf16.msra.mxu0 %v711_v17 }
  0x25   :  { %635 = vmatprep.subr.bf16.mxu0 %v714_v20 }
  0x26   :  { %656 = vmatpush3.bf16.msra.mxu1 %v713_v19 }
  0x27   :  { %657 = vmatprep.subr.bf16.mxu1 %v716_v22 }
  0x28   :  { %636 = vmatpush3.bf16.msra.mxu0 %v715_v21 }
  0x29   :  { %637 = vmatprep.subr.bf16.mxu0 %v718_v24 }
  0x2a   :  { %658 = vmatpush3.bf16.msra.mxu1 %v717_v23 }
  0x2b   :  { %659 = vmatprep.subr.bf16.mxu1 %v720_v26 }
  0x2c   :  { %638 = vmatpush3.bf16.msra.mxu0 %v719_v25 }
  0x2d   :  { %639 = vmatprep.subr.bf16.mxu0 %v722_v28 }
  0x2e   :  { %660 = vmatpush3.bf16.msra.mxu1 %v721_v27 }
  0x2f   :  { %661 = vmatprep.subr.bf16.mxu1 %v724_v30 }
  0x30   :  { %640 = vmatpush3.bf16.msra.mxu0 %v723_v29 }
  0x31   :  { %669 = vmatprep.subr.bf16.mxu0 %v728_v35 }
  0x32   :  { %662 = vmatpush3.bf16.msra.mxu1 %v727_v34 }
  0x33   :  { %477 = vmatmul.mubr.bf16.vlgmr.msra.gmra.mrb[0].mxu0 %v571_v32 }
  0x34   :  { %670 = vmatpush3.bf16.msra.mxu0 %v731_v39  ;;  %556 = vmatprep.mubr.bf16.mxu0 %v576_v50 }
  0x35   :  { %517 = vmatmul.mubr.bf16.vlgmr.msra.gmra.mrb[0].mxu1 %v573_v37  ;;  %671 = vmatprep.subr.bf16.mxu0 %v732_v40 }
  0x38   :  { %672 = vmatpush3.bf16.msra.mxu0 %v733_v41 }
  0x39   :  { %673 = vmatprep.subr.bf16.mxu0 %v734_v42 }
  0x3c   :  { %674 = vmatpush3.bf16.msra.mxu0 %v735_v43 }
  0x3d   :  { %675 = vmatprep.subr.bf16.mxu0 %v736_v44 }
  0x40   :  { %676 = vmatpush3.bf16.msra.mxu0 %v737_v45 }
  0x41   :  { %677 = vmatprep.subr.bf16.mxu0 %v738_v46 }
  0x44   :  { %678 = vmatpush3.bf16.msra.mxu0 %v739_v47 }
  0x45   :  { %679 = vmatprep.subr.bf16.mxu0 %v740_v49 }
  0x48   :  { %680 = vmatpush3.bf16.msra.mxu0 %v741_v51 }
  0x49   :  { %681 = vmatprep.subr.bf16.mxu0 %v742_v52 }
  0x4c   :  { %682 = vmatpush3.bf16.msra.mxu0 %v743_v53 }
  0x4d   :  { %683 = vmatprep.subr.bf16.mxu0 %v744_v54 }
  0x50   :  { %684 = vmatpush3.bf16.msra.mxu0 %v745_v55 }
  0x53   :  { %557 = vmatmul.mubr.bf16.vlgmr.msra.gmra.mrb[4].mxu0 %v575_v56 }
 0x106   :  { %v641_v57 = vpop.f32.mrb[0].mxu0 }
 0x107   :  { %v642_v59 = vpop.f32.mrb[1].mxu0 }
 0x108   :  { %v643_v60 = vadd.f32 %v642_v59, %v641_v57  ;;  %v644_v61 = vpop.f32.mrb[2].mxu0  ;;  %v663_v62 = vpop.f32.mrb[0].mxu1 }
 0x109   :  { %v645_v63 = vpop.f32.mrb[3].mxu0  ;;  %v664_v0 = vpop.f32.mrb[1].mxu1 }
 0x10a   :  { %v479_v1 = vadd.f32 %v643_v60, %v570_v58  ;;  %v665_v2 = vadd.f32 %v664_v0, %v663_v62  ;;  %v666_v3 = vpop.f32.mrb[2].mxu1 }
 0x10b   :  { %v667_v4 = vpop.f32.mrb[3].mxu1 }
 0x10c   :  { %v519_v5 = vadd.f32 %v665_v2, %v479_v1 }
 0x126   :  { %v685_v6 = vpop.f32.mrb[4].mxu0 }
 0x127   :  { %v686_v7 = vpop.f32.mrb[5].mxu0 }
 0x128   :  { %v687_v8 = vadd.f32 %v686_v7, %v685_v6  ;;  %v688_v9 = vpop.f32.mrb[6].mxu0 }
 0x129   :  { %v689_v10 = vpop.f32.mrb[7].mxu0 }
 0x12a   :  { %v559_v11 = vadd.f32 %v687_v8, %v519_v5 }
 0x12c   :  { %564 = vst [vmem:[%s825_s3] sm:$0xff] %v559_v11 }
 0x12d   :  { %569 = vsyncpa [#allocation3], 1 }

</bundles_post_ra>
